<compile_context>
chip_gen: v5e
topology: v5e:2x2
jax: 0.10.0
libtpu: 0.0.40
codegen_flags: <defaults>
</compile_context>

<pallas_src>
import functools

import jax
import jax.numpy as jnp
from jax.experimental import pallas as pl
from jax.experimental.pallas import tpu as pltpu

LANE = 128  # TPU lane width: every feature dim is zero-padded to this.


# ----------------------------------------------------------------------------
# Fused kernel: entire CauVAE forward, activations live in VMEM.
# ----------------------------------------------------------------------------
def _cauvae_kernel(
    # inputs (padded to LANE on the feature axis)
    x_ref, eps_ref,
    enc_h_w_ref, enc_h_b_ref,
    enc_m_w_ref, enc_m_b_ref,
    enc_v_w_ref, enc_v_b_ref,
    decu_h_w_ref, decu_h_b_ref,
    decu_o_w_ref, decu_o_b_ref,
    decd_w_ref, decd_b_ref,
    dpd_w_ref, dpd_b_ref,
    # outputs
    qz_m_ref, qz_v_ref, z_ref, x_up_rec_ref, x_down_ref, logit_ref, prob_ref,
    *, n_causal,
):
    f32 = jnp.float32
    x = x_ref[...]                                           # [B, P]

    # ---- Encoder (FeatureWeight_up + BN folded into enc_h_w / enc_h_b) ----
    h = jnp.dot(x, enc_h_w_ref[...], preferred_element_type=f32) + enc_h_b_ref[...]
    h = jnp.maximum(h, 0.0)                                  # ReLU; dropout = identity (eval)
    qz_m = jnp.dot(h, enc_m_w_ref[...], preferred_element_type=f32) + enc_m_b_ref[...]
    qz_v = jnp.dot(h, enc_v_w_ref[...], preferred_element_type=f32) + enc_v_b_ref[...]
    # reparameterization: z = qz_m + sqrt(softplus(qz_v)) * eps   (EUP work, fused)
    z = qz_m + jnp.sqrt(jax.nn.softplus(qz_v)) * eps_ref[...]

    qz_m_ref[...] = qz_m
    qz_v_ref[...] = qz_v
    z_ref[...] = z

    # ---- Decoder up (BN folded) ----
    h2 = jnp.dot(z, decu_h_w_ref[...], preferred_element_type=f32) + decu_h_b_ref[...]
    h2 = jnp.maximum(h2, 0.0)
    x_up_rec_ref[...] = (
        jnp.dot(h2, decu_o_w_ref[...], preferred_element_type=f32) + decu_o_b_ref[...]
    )

    # ---- alpha_z: keep first n_causal cols of z, replace the rest with the
    #      column-wise batch mean (XLU sublane reduce). Padded cols stay 0. ----
    col_mean = jnp.mean(z, axis=0, keepdims=True)            # [1, P]
    col_ids = jax.lax.broadcasted_iota(jnp.int32, z.shape, 1)
    alpha_z = jnp.where(col_ids < n_causal, z, jnp.broadcast_to(col_mean, z.shape))

    # ---- Decoder down, batched over [z ; alpha_z]  ->  one matmul ----
    z_both = jnp.concatenate([z, alpha_z], axis=0)           # [2B, P]
    x_down_both = (
        jnp.dot(z_both, decd_w_ref[...], preferred_element_type=f32) + decd_b_ref[...]
    )
    x_down_ref[...] = x_down_both                            # rows [:B] = x_down_pred

    # ---- DPD head (FeatureWeight_down folded into dpd_w). Dout == 1, so use a
    #      VPU multiply + lane reduction instead of a 1-column MXU matmul.
    #      Compute the logit ONCE; prob = sigmoid(logit). Results are broadcast
    #      across lanes so stores stay lane-dense. ----
    w_row = dpd_w_ref[...]                                   # [1, P]
    logit = jnp.sum(x_down_both * w_row, axis=-1, keepdims=True)  # [2B, 1]
    logit = logit + dpd_b_ref[...][:, :1]
    logit_ref[...] = jnp.broadcast_to(logit, logit_ref.shape)
    prob_ref[...] = jnp.broadcast_to(jax.nn.sigmoid(logit), prob_ref.shape)


def _full(shape):
    return pl.BlockSpec(shape, lambda i: (0,) * len(shape))


def cauvae_forward(params, x_up, eps, dims):
    """Pad to lane-dense tiles, run the fused kernel once, slice logical outputs."""
    B = x_up.shape[0]
    P = LANE
    niu, nid, nl, nc = (dims["n_input_up"], dims["n_input_down"],
                        dims["n_latent"], dims["n_causal"])

    x_pad = jnp.zeros((B, P), jnp.float32).at[:, :niu].set(x_up)
    eps_pad = jnp.zeros((B, P), jnp.float32).at[:, :nl].set(eps)

    w = params["folded"]
    ins = (x_pad, eps_pad,
           w["enc_h_w"], w["enc_h_b"], w["enc_m_w"], w["enc_m_b"],
           w["enc_v_w"], w["enc_v_b"],
           w["decu_h_w"], w["decu_h_b"], w["decu_o_w"], w["decu_o_b"],
           w["decd_w"], w["decd_b"], w["dpd_w"], w["dpd_b"])

    out_shapes = (
        jax.ShapeDtypeStruct((B, P), jnp.float32),       # qz_m
        jax.ShapeDtypeStruct((B, P), jnp.float32),       # qz_v
        jax.ShapeDtypeStruct((B, P), jnp.float32),       # z
        jax.ShapeDtypeStruct((B, P), jnp.float32),       # x_up_rec
        jax.ShapeDtypeStruct((2 * B, P), jnp.float32),   # x_down (org ; alpha)
        jax.ShapeDtypeStruct((2 * B, P), jnp.float32),   # dpd logit (lane-broadcast)
        jax.ShapeDtypeStruct((2 * B, P), jnp.float32),   # dpd prob  (lane-broadcast)
    )

    kernel = functools.partial(_cauvae_kernel, n_causal=nc)
    qz_m, qz_v, z, x_up_rec, x_down_both, logit_both, prob_both = pl.pallas_call(
        kernel,
        grid=(1,),
        out_shape=out_shapes,
        in_specs=[_full(a.shape) for a in ins],
        out_specs=tuple(_full(s.shape) for s in out_shapes),
        compiler_params=pltpu.CompilerParams(dimension_semantics=("arbitrary",)),
    )(*ins)

    latent_up = dict(qz_m=qz_m[:, :nl], qz_v=qz_v[:, :nl], z=z[:, :nl])
    return dict(
        latent_up=latent_up,
        x_up_rec=x_up_rec[:, :niu],
        x_down_pred=x_down_both[:B, :nid],
        feat_w_up=params["feat_w_up"],
        feat_w_down=params["feat_w_down"],
        org_dpd=dict(logit=logit_both[:B, :1], prob=prob_both[:B, :1]),
        alpha_dpd=dict(logit=logit_both[B:, :1], prob=prob_both[B:, :1]),
    )


# ----------------------------------------------------------------------------
# Parameter init: logical params + folded/padded kernel params.
# ----------------------------------------------------------------------------
def init_params(key, n_input_up, n_input_down, n_hidden, n_latent, bn_eps=1e-5):
    ks = jax.random.split(key, 8)

    def lin(k, din, dout):
        kw, kb = jax.random.split(k)
        wm = 0.1 * jax.random.normal(kw, (din, dout), jnp.float32)
        bv = 0.01 * jax.random.normal(kb, (dout,), jnp.float32)
        return wm, bv

    # logical (un-padded) params; nn.Linear weights stored pre-transposed [in, out]
    feat_w_up = jnp.ones((n_input_up,), jnp.float32)     # FeatureWeight init = ones
    feat_w_down = jnp.ones((n_input_down,), jnp.float32)
    enc_h_w, enc_h_b = lin(ks[0], n_input_up, n_hidden)
    enc_m_w, enc_m_b = lin(ks[1], n_hidden, n_latent)
    enc_v_w, enc_v_b = lin(ks[2], n_hidden, n_latent)
    decu_h_w, decu_h_b = lin(ks[3], n_latent, n_hidden)
    decu_o_w, decu_o_b = lin(ks[4], n_hidden, n_input_up)
    decd_w, decd_b = lin(ks[5], n_latent, n_input_down)   # decoder_linear=True
    dpd_w, dpd_b = lin(ks[6], n_input_down, 1)            # dpd_linear=True

    # eval-mode BatchNorm1d fold (running_mean=0, running_var=1, gamma=1, beta=0)
    bn_scale = float(1.0 / jnp.sqrt(1.0 + bn_eps))
    bn_shift = 0.0

    # fold FeatureWeight_up + BN into encoder hidden layer
    enc_h_w_f = (feat_w_up[:, None] * enc_h_w) * bn_scale
    enc_h_b_f = enc_h_b * bn_scale + bn_shift
    # fold BN into decoder-up hidden layer
    decu_h_w_f = decu_h_w * bn_scale
    decu_h_b_f = decu_h_b * bn_scale + bn_shift
    # fold FeatureWeight_down into dpd weight:  (x*fw) @ w + b == x @ (fw*w) + b
    dpd_w_f = feat_w_down * dpd_w[:, 0]

    def pad_mat(m):
        out = jnp.zeros((LANE, LANE), jnp.float32)
        return out.at[: m.shape[0], : m.shape[1]].set(m)

    def pad_row(v):
        out = jnp.zeros((1, LANE), jnp.float32)
        return out.at[0, : v.shape[0]].set(v)

    folded = dict(
        enc_h_w=pad_mat(enc_h_w_f), enc_h_b=pad_row(enc_h_b_f),
        enc_m_w=pad_mat(enc_m_w), enc_m_b=pad_row(enc_m_b),
        enc_v_w=pad_mat(enc_v_w), enc_v_b=pad_row(enc_v_b),
        decu_h_w=pad_mat(decu_h_w_f), decu_h_b=pad_row(decu_h_b_f),
        decu_o_w=pad_mat(decu_o_w), decu_o_b=pad_row(decu_o_b),
        decd_w=pad_mat(decd_w), decd_b=pad_row(decd_b),
        dpd_w=pad_row(dpd_w_f),
        dpd_b=jnp.full((1, LANE), dpd_b[0], jnp.float32),
    )
    logical = dict(
        enc_h_w=enc_h_w, enc_h_b=enc_h_b, enc_m_w=enc_m_w, enc_m_b=enc_m_b,
        enc_v_w=enc_v_w, enc_v_b=enc_v_b, decu_h_w=decu_h_w, decu_h_b=decu_h_b,
        decu_o_w=decu_o_w, decu_o_b=decu_o_b, decd_w=decd_w, decd_b=decd_b,
        dpd_w=dpd_w, dpd_b=dpd_b,
    )
    return dict(feat_w_up=feat_w_up, feat_w_down=feat_w_down,
                folded=folded, logical=logical,
                bn_scale=bn_scale, bn_shift=bn_shift)


# ----------------------------------------------------------------------------
# Pure-JAX reference (unfolded, unpadded) for a correctness check.
# ----------------------------------------------------------------------------
def reference_forward(params, x_up, eps, dims):
    p = params["logical"]
    bn_s, bn_t = params["bn_scale"], params["bn_shift"]
    hp = jax.lax.Precision.HIGHEST

    def dot(a, b):
        return jnp.dot(a, b, precision=hp)

    x1 = x_up * params["feat_w_up"]
    h = jnp.maximum((dot(x1, p["enc_h_w"]) + p["enc_h_b"]) * bn_s + bn_t, 0.0)
    qz_m = dot(h, p["enc_m_w"]) + p["enc_m_b"]
    qz_v = dot(h, p["enc_v_w"]) + p["enc_v_b"]
    z = qz_m + jnp.sqrt(jax.nn.softplus(qz_v)) * eps

    h2 = jnp.maximum((dot(z, p["decu_h_w"]) + p["decu_h_b"]) * bn_s + bn_t, 0.0)
    x_up_rec = dot(h2, p["decu_o_w"]) + p["decu_o_b"]

    x_down_pred = dot(z, p["decd_w"]) + p["decd_b"]
    x2 = x_down_pred * params["feat_w_down"]
    org_logit = dot(x2, p["dpd_w"]) + p["dpd_b"]

    nc = dims["n_causal"]
    col_mean = jnp.mean(z, axis=0, keepdims=True)
    alpha_z = jnp.concatenate(
        [z[:, :nc], jnp.broadcast_to(col_mean[:, nc:], (z.shape[0], z.shape[1] - nc))],
        axis=1)
    x_down_alpha = dot(alpha_z, p["decd_w"]) + p["decd_b"]
    x2a = x_down_alpha * params["feat_w_down"]
    alpha_logit = dot(x2a, p["dpd_w"]) + p["dpd_b"]

    return dict(
        latent_up=dict(qz_m=qz_m, qz_v=qz_v, z=z),
        x_up_rec=x_up_rec,
        x_down_pred=x_down_pred,
        org_dpd=dict(logit=org_logit, prob=jax.nn.sigmoid(org_logit)),
        alpha_dpd=dict(logit=alpha_logit, prob=jax.nn.sigmoid(alpha_logit)),
    )


# ----------------------------------------------------------------------------
if __name__ == "__main__":
    B = 8
    dims = dict(n_input_up=32, n_input_down=16, n_hidden=32, n_latent=8, n_causal=4)

    key = jax.random.PRNGKey(0)
    kx, kp, ke = jax.random.split(key, 3)
    x_up = jax.random.normal(kx, (B, dims["n_input_up"]), jnp.float32)
    eps = jax.random.normal(ke, (B, dims["n_latent"]), jnp.float32)  # reparam noise
    params = init_params(kp, dims["n_input_up"], dims["n_input_down"],
                         dims["n_hidden"], dims["n_latent"])

    fwd = jax.jit(lambda p, x, e: cauvae_forward(p, x, e, dims))
    out = jax.block_until_ready(fwd(params, x_up, eps))
    ref = jax.block_until_ready(reference_forward(params, x_up, eps, dims))

    # shape checks
    assert out["x_up_rec"].shape == (B, dims["n_input_up"])
    assert out["x_down_pred"].shape == (B, dims["n_input_down"])
    assert out["latent_up"]["z"].shape == (B, dims["n_latent"])
    assert out["org_dpd"]["logit"].shape == (B, 1)
    assert out["alpha_dpd"]["prob"].shape == (B, 1)

    # numerical check against the pure-JAX reference
    pairs = [
        (out["latent_up"]["qz_m"], ref["latent_up"]["qz_m"]),
        (out["latent_up"]["qz_v"], ref["latent_up"]["qz_v"]),
        (out["latent_up"]["z"], ref["latent_up"]["z"]),
        (out["x_up_rec"], ref["x_up_rec"]),
        (out["x_down_pred"], ref["x_down_pred"]),
        (out["org_dpd"]["logit"], ref["org_dpd"]["logit"]),
        (out["org_dpd"]["prob"], ref["org_dpd"]["prob"]),
        (out["alpha_dpd"]["logit"], ref["alpha_dpd"]["logit"]),
        (out["alpha_dpd"]["prob"], ref["alpha_dpd"]["prob"]),
    ]
    for a, b in pairs:
        err = float(jnp.max(jnp.abs(a - b)))
        assert jnp.allclose(a, b, rtol=2e-2, atol=2e-2), f"max abs err {err}"

    print("KERNEL_OK")
</pallas_src>

<mosaic_0001>
module attributes {stable_mosaic.version = 11 : i64} {
  func.func @_cauvae_kernel(%arg0: i32, %arg1: memref<8x128xf32, #tpu.memory_space<vmem>>, %arg2: memref<8x128xf32, #tpu.memory_space<vmem>>, %arg3: memref<128x128xf32, #tpu.memory_space<vmem>>, %arg4: memref<1x128xf32, #tpu.memory_space<vmem>>, %arg5: memref<128x128xf32, #tpu.memory_space<vmem>>, %arg6: memref<1x128xf32, #tpu.memory_space<vmem>>, %arg7: memref<128x128xf32, #tpu.memory_space<vmem>>, %arg8: memref<1x128xf32, #tpu.memory_space<vmem>>, %arg9: memref<128x128xf32, #tpu.memory_space<vmem>>, %arg10: memref<1x128xf32, #tpu.memory_space<vmem>>, %arg11: memref<128x128xf32, #tpu.memory_space<vmem>>, %arg12: memref<1x128xf32, #tpu.memory_space<vmem>>, %arg13: memref<128x128xf32, #tpu.memory_space<vmem>>, %arg14: memref<1x128xf32, #tpu.memory_space<vmem>>, %arg15: memref<1x128xf32, #tpu.memory_space<vmem>>, %arg16: memref<1x128xf32, #tpu.memory_space<vmem>>, %arg17: memref<8x128xf32, #tpu.memory_space<vmem>>, %arg18: memref<8x128xf32, #tpu.memory_space<vmem>>, %arg19: memref<8x128xf32, #tpu.memory_space<vmem>>, %arg20: memref<8x128xf32, #tpu.memory_space<vmem>>, %arg21: memref<16x128xf32, #tpu.memory_space<vmem>>, %arg22: memref<16x128xf32, #tpu.memory_space<vmem>>, %arg23: memref<16x128xf32, #tpu.memory_space<vmem>>) attributes {dimension_semantics = [#tpu.dimension_semantics<arbitrary>], iteration_bounds = array<i64: 1>, scalar_prefetch = 0 : i64, scratch_operands = 0 : i64, tpu.core_type = #tpu.core_type<tc>, window_params = [{pipeline_mode = #tpu.pipeline_mode<synchronous>, transform_indices = @transform_0, window_bounds = array<i64: 8, 128>}, {pipeline_mode = #tpu.pipeline_mode<synchronous>, transform_indices = @transform_1, window_bounds = array<i64: 8, 128>}, {pipeline_mode = #tpu.pipeline_mode<synchronous>, transform_indices = @transform_2, window_bounds = array<i64: 128, 128>}, {pipeline_mode = #tpu.pipeline_mode<synchronous>, transform_indices = @transform_3, window_bounds = array<i64: 1, 128>}, {pipeline_mode = #tpu.pipeline_mode<synchronous>, transform_indices = @transform_4, window_bounds = array<i64: 128, 128>}, {pipeline_mode = #tpu.pipeline_mode<synchronous>, transform_indices = @transform_5, window_bounds = array<i64: 1, 128>}, {pipeline_mode = #tpu.pipeline_mode<synchronous>, transform_indices = @transform_6, window_bounds = array<i64: 128, 128>}, {pipeline_mode = #tpu.pipeline_mode<synchronous>, transform_indices = @transform_7, window_bounds = array<i64: 1, 128>}, {pipeline_mode = #tpu.pipeline_mode<synchronous>, transform_indices = @transform_8, window_bounds = array<i64: 128, 128>}, {pipeline_mode = #tpu.pipeline_mode<synchronous>, transform_indices = @transform_9, window_bounds = array<i64: 1, 128>}, {pipeline_mode = #tpu.pipeline_mode<synchronous>, transform_indices = @transform_10, window_bounds = array<i64: 128, 128>}, {pipeline_mode = #tpu.pipeline_mode<synchronous>, transform_indices = @transform_11, window_bounds = array<i64: 1, 128>}, {pipeline_mode = #tpu.pipeline_mode<synchronous>, transform_indices = @transform_12, window_bounds = array<i64: 128, 128>}, {pipeline_mode = #tpu.pipeline_mode<synchronous>, transform_indices = @transform_13, window_bounds = array<i64: 1, 128>}, {pipeline_mode = #tpu.pipeline_mode<synchronous>, transform_indices = @transform_14, window_bounds = array<i64: 1, 128>}, {pipeline_mode = #tpu.pipeline_mode<synchronous>, transform_indices = @transform_15, window_bounds = array<i64: 1, 128>}, {pipeline_mode = #tpu.pipeline_mode<synchronous>, transform_indices = @transform_16, window_bounds = array<i64: 8, 128>}, {pipeline_mode = #tpu.pipeline_mode<synchronous>, transform_indices = @transform_17, window_bounds = array<i64: 8, 128>}, {pipeline_mode = #tpu.pipeline_mode<synchronous>, transform_indices = @transform_18, window_bounds = array<i64: 8, 128>}, {pipeline_mode = #tpu.pipeline_mode<synchronous>, transform_indices = @transform_19, window_bounds = array<i64: 8, 128>}, {pipeline_mode = #tpu.pipeline_mode<synchronous>, transform_indices = @transform_20, window_bounds = array<i64: 16, 128>}, {pipeline_mode = #tpu.pipeline_mode<synchronous>, transform_indices = @transform_21, window_bounds = array<i64: 16, 128>}, {pipeline_mode = #tpu.pipeline_mode<synchronous>, transform_indices = @transform_22, window_bounds = array<i64: 16, 128>}]} {
    %c0 = arith.constant 0 : index
    %c0_0 = arith.constant 0 : index
    %0 = vector.load %arg1[%c0, %c0_0] : memref<8x128xf32, #tpu.memory_space<vmem>>, vector<8x128xf32>
    %c0_1 = arith.constant 0 : index
    %c0_2 = arith.constant 0 : index
    %1 = vector.load %arg3[%c0_1, %c0_2] : memref<128x128xf32, #tpu.memory_space<vmem>>, vector<128x128xf32>
    %cst = arith.constant dense<0.000000e+00> : vector<8x128xf32>
    %2 = tpu.matmul %0, %1, %cst {dimension_numbers = #tpu.dot_dimension_numbers<[1], [0], [0], [1], [0, 0, 1, 1], [], []>} : vector<8x128xf32>, vector<128x128xf32>, vector<8x128xf32> -> vector<8x128xf32>
    %c0_3 = arith.constant 0 : index
    %c0_4 = arith.constant 0 : index
    %3 = vector.load %arg4[%c0_3, %c0_4] : memref<1x128xf32, #tpu.memory_space<vmem>>, vector<1x128xf32>
    %4 = vector.broadcast %3 : vector<1x128xf32> to vector<8x128xf32>
    %5 = arith.addf %2, %4 : vector<8x128xf32>
    %cst_5 = arith.constant 0.000000e+00 : f32
    %6 = vector.broadcast %cst_5 : f32 to vector<8x128xf32>
    %7 = arith.maximumf %5, %6 : vector<8x128xf32>
    %c0_6 = arith.constant 0 : index
    %c0_7 = arith.constant 0 : index
    %8 = vector.load %arg5[%c0_6, %c0_7] : memref<128x128xf32, #tpu.memory_space<vmem>>, vector<128x128xf32>
    %cst_8 = arith.constant dense<0.000000e+00> : vector<8x128xf32>
    %9 = tpu.matmul %7, %8, %cst_8 {dimension_numbers = #tpu.dot_dimension_numbers<[1], [0], [0], [1], [0, 0, 1, 1], [], []>} : vector<8x128xf32>, vector<128x128xf32>, vector<8x128xf32> -> vector<8x128xf32>
    %c0_9 = arith.constant 0 : index
    %c0_10 = arith.constant 0 : index
    %10 = vector.load %arg6[%c0_9, %c0_10] : memref<1x128xf32, #tpu.memory_space<vmem>>, vector<1x128xf32>
    %11 = vector.broadcast %10 : vector<1x128xf32> to vector<8x128xf32>
    %12 = arith.addf %9, %11 : vector<8x128xf32>
    %c0_11 = arith.constant 0 : index
    %c0_12 = arith.constant 0 : index
    %13 = vector.load %arg7[%c0_11, %c0_12] : memref<128x128xf32, #tpu.memory_space<vmem>>, vector<128x128xf32>
    %cst_13 = arith.constant dense<0.000000e+00> : vector<8x128xf32>
    %14 = tpu.matmul %7, %13, %cst_13 {dimension_numbers = #tpu.dot_dimension_numbers<[1], [0], [0], [1], [0, 0, 1, 1], [], []>} : vector<8x128xf32>, vector<128x128xf32>, vector<8x128xf32> -> vector<8x128xf32>
    %c0_14 = arith.constant 0 : index
    %c0_15 = arith.constant 0 : index
    %15 = vector.load %arg8[%c0_14, %c0_15] : memref<1x128xf32, #tpu.memory_space<vmem>>, vector<1x128xf32>
    %16 = vector.broadcast %15 : vector<1x128xf32> to vector<8x128xf32>
    %17 = arith.addf %14, %16 : vector<8x128xf32>
    %cst_16 = arith.constant 0.000000e+00 : f32
    %18 = vector.broadcast %cst_16 : f32 to vector<8x128xf32>
    %19 = arith.maximumf %17, %18 : vector<8x128xf32>
    %20 = vector.broadcast %cst_16 : f32 to vector<8x128xf32>
    %21 = arith.subf %17, %20 : vector<8x128xf32>
    %22 = arith.cmpf one, %21, %21 : vector<8x128xf32>
    %23 = vector.broadcast %cst_16 : f32 to vector<8x128xf32>
    %24 = arith.addf %17, %23 : vector<8x128xf32>
    %25 = math.absf %21 : vector<8x128xf32>
    %cst_17 = arith.constant 0.000000e+00 : f32
    %26 = vector.broadcast %cst_17 : f32 to vector<8x128xf32>
    %27 = arith.subf %26, %25 : vector<8x128xf32>
    %28 = math.exp %27 : vector<8x128xf32>
    %29 = math.log1p %28 : vector<8x128xf32>
    %30 = arith.addf %19, %29 : vector<8x128xf32>
    %31 = arith.select %22, %24, %30 : vector<8x128xi1>, vector<8x128xf32>
    %32 = math.sqrt %31 : vector<8x128xf32>
    %c0_18 = arith.constant 0 : index
    %c0_19 = arith.constant 0 : index
    %33 = vector.load %arg2[%c0_18, %c0_19] : memref<8x128xf32, #tpu.memory_space<vmem>>, vector<8x128xf32>
    %34 = arith.mulf %32, %33 : vector<8x128xf32>
    %35 = arith.addf %12, %34 : vector<8x128xf32>
    %c0_20 = arith.constant 0 : index
    %c0_21 = arith.constant 0 : index
    %36 = vector.load %arg17[%c0_20, %c0_21] : memref<8x128xf32, #tpu.memory_space<vmem>>, vector<8x128xf32>
    tpu.vector_store %arg17[%c0_20, %c0_21], %12 {strides = array<i32>} : memref<8x128xf32, #tpu.memory_space<vmem>>, vector<8x128xf32>,
    %c0_22 = arith.constant 0 : index
    %c0_23 = arith.constant 0 : index
    %37 = vector.load %arg18[%c0_22, %c0_23] : memref<8x128xf32, #tpu.memory_space<vmem>>, vector<8x128xf32>
    tpu.vector_store %arg18[%c0_22, %c0_23], %17 {strides = array<i32>} : memref<8x128xf32, #tpu.memory_space<vmem>>, vector<8x128xf32>,
    %c0_24 = arith.constant 0 : index
    %c0_25 = arith.constant 0 : index
    %38 = vector.load %arg19[%c0_24, %c0_25] : memref<8x128xf32, #tpu.memory_space<vmem>>, vector<8x128xf32>
    tpu.vector_store %arg19[%c0_24, %c0_25], %35 {strides = array<i32>} : memref<8x128xf32, #tpu.memory_space<vmem>>, vector<8x128xf32>,
    %c0_26 = arith.constant 0 : index
    %c0_27 = arith.constant 0 : index
    %39 = vector.load %arg9[%c0_26, %c0_27] : memref<128x128xf32, #tpu.memory_space<vmem>>, vector<128x128xf32>
    %cst_28 = arith.constant dense<0.000000e+00> : vector<8x128xf32>
    %40 = tpu.matmul %35, %39, %cst_28 {dimension_numbers = #tpu.dot_dimension_numbers<[1], [0], [0], [1], [0, 0, 1, 1], [], []>} : vector<8x128xf32>, vector<128x128xf32>, vector<8x128xf32> -> vector<8x128xf32>
    %c0_29 = arith.constant 0 : index
    %c0_30 = arith.constant 0 : index
    %41 = vector.load %arg10[%c0_29, %c0_30] : memref<1x128xf32, #tpu.memory_space<vmem>>, vector<1x128xf32>
    %42 = vector.broadcast %41 : vector<1x128xf32> to vector<8x128xf32>
    %43 = arith.addf %40, %42 : vector<8x128xf32>
    %cst_31 = arith.constant 0.000000e+00 : f32
    %44 = vector.broadcast %cst_31 : f32 to vector<8x128xf32>
    %45 = arith.maximumf %43, %44 : vector<8x128xf32>
    %c0_32 = arith.constant 0 : index
    %c0_33 = arith.constant 0 : index
    %46 = vector.load %arg11[%c0_32, %c0_33] : memref<128x128xf32, #tpu.memory_space<vmem>>, vector<128x128xf32>
    %cst_34 = arith.constant dense<0.000000e+00> : vector<8x128xf32>
    %47 = tpu.matmul %45, %46, %cst_34 {dimension_numbers = #tpu.dot_dimension_numbers<[1], [0], [0], [1], [0, 0, 1, 1], [], []>} : vector<8x128xf32>, vector<128x128xf32>, vector<8x128xf32> -> vector<8x128xf32>
    %c0_35 = arith.constant 0 : index
    %c0_36 = arith.constant 0 : index
    %48 = vector.load %arg12[%c0_35, %c0_36] : memref<1x128xf32, #tpu.memory_space<vmem>>, vector<1x128xf32>
    %49 = vector.broadcast %48 : vector<1x128xf32> to vector<8x128xf32>
    %50 = arith.addf %47, %49 : vector<8x128xf32>
    %c0_37 = arith.constant 0 : index
    %c0_38 = arith.constant 0 : index
    %51 = vector.load %arg20[%c0_37, %c0_38] : memref<8x128xf32, #tpu.memory_space<vmem>>, vector<8x128xf32>
    tpu.vector_store %arg20[%c0_37, %c0_38], %50 {strides = array<i32>} : memref<8x128xf32, #tpu.memory_space<vmem>>, vector<8x128xf32>,
    %cst_39 = arith.constant dense<0.000000e+00> : vector<128xf32>
    %52 = vector.multi_reduction <add>, %35, %cst_39 [0] : vector<8x128xf32> to vector<128xf32>
    %53 = vector.shape_cast %52 : vector<128xf32> to vector<1x128xf32>
    %cst_40 = arith.constant 8.000000e+00 : f32
    %54 = vector.broadcast %cst_40 : f32 to vector<1x128xf32>
    %55 = arith.divf %53, %54 : vector<1x128xf32>
    %56 = tpu.iota {dimensions = array<i32: 1>} : vector<8x128xi32>
    %c4_i32 = arith.constant 4 : i32
    %57 = vector.broadcast %c4_i32 : i32 to vector<8x128xi32>
    %58 = arith.cmpi slt, %56, %57 : vector<8x128xi32>
    %59 = vector.shape_cast %55 : vector<1x128xf32> to vector<1x128xf32>
    %60 = vector.broadcast %59 : vector<1x128xf32> to vector<8x128xf32>
    %61 = arith.select %58, %35, %60 : vector<8x128xi1>, vector<8x128xf32>
    %62 = tpu.concatenate %35, %61 in 0 : vector<8x128xf32>, vector<8x128xf32> -> vector<16x128xf32>
    %c0_41 = arith.constant 0 : index
    %c0_42 = arith.constant 0 : index
    %63 = vector.load %arg13[%c0_41, %c0_42] : memref<128x128xf32, #tpu.memory_space<vmem>>, vector<128x128xf32>
    %cst_43 = arith.constant dense<0.000000e+00> : vector<16x128xf32>
    %64 = tpu.matmul %62, %63, %cst_43 {dimension_numbers = #tpu.dot_dimension_numbers<[1], [0], [0], [1], [0, 0, 1, 1], [], []>} : vector<16x128xf32>, vector<128x128xf32>, vector<16x128xf32> -> vector<16x128xf32>
    %c0_44 = arith.constant 0 : index
    %c0_45 = arith.constant 0 : index
    %65 = vector.load %arg14[%c0_44, %c0_45] : memref<1x128xf32, #tpu.memory_space<vmem>>, vector<1x128xf32>
    %66 = vector.broadcast %65 : vector<1x128xf32> to vector<16x128xf32>
    %67 = arith.addf %64, %66 : vector<16x128xf32>
    %c0_46 = arith.constant 0 : index
    %c0_47 = arith.constant 0 : index
    %68 = vector.load %arg21[%c0_46, %c0_47] : memref<16x128xf32, #tpu.memory_space<vmem>>, vector<16x128xf32>
    tpu.vector_store %arg21[%c0_46, %c0_47], %67 {strides = array<i32>} : memref<16x128xf32, #tpu.memory_space<vmem>>, vector<16x128xf32>,
    %c0_48 = arith.constant 0 : index
    %c0_49 = arith.constant 0 : index
    %69 = vector.load %arg15[%c0_48, %c0_49] : memref<1x128xf32, #tpu.memory_space<vmem>>, vector<1x128xf32>
    %70 = vector.broadcast %69 : vector<1x128xf32> to vector<16x128xf32>
    %71 = arith.mulf %67, %70 : vector<16x128xf32>
    %cst_50 = arith.constant dense<0.000000e+00> : vector<16xf32>
    %72 = vector.multi_reduction <add>, %71, %cst_50 [1] : vector<16x128xf32> to vector<16xf32>
    %73 = vector.shape_cast %72 : vector<16xf32> to vector<16x1xf32>
    %c0_51 = arith.constant 0 : index
    %c0_52 = arith.constant 0 : index
    %74 = vector.load %arg16[%c0_51, %c0_52] : memref<1x128xf32, #tpu.memory_space<vmem>>, vector<1x128xf32>
    %75 = vector.extract_strided_slice %74 {offsets = [0, 0], sizes = [1, 1], strides = [1, 1]} : vector<1x128xf32> to vector<1x1xf32>
    %76 = vector.broadcast %75 : vector<1x1xf32> to vector<16x1xf32>
    %77 = arith.addf %73, %76 : vector<16x1xf32>
    %78 = vector.shape_cast %77 : vector<16x1xf32> to vector<16x1xf32>
    %79 = vector.broadcast %78 : vector<16x1xf32> to vector<16x128xf32>
    %c0_53 = arith.constant 0 : index
    %c0_54 = arith.constant 0 : index
    %80 = vector.load %arg22[%c0_53, %c0_54] : memref<16x128xf32, #tpu.memory_space<vmem>>, vector<16x128xf32>
    tpu.vector_store %arg22[%c0_53, %c0_54], %79 {strides = array<i32>} : memref<16x128xf32, #tpu.memory_space<vmem>>, vector<16x128xf32>,
    %81 = arith.negf %77 : vector<16x1xf32>
    %82 = math.exp %81 : vector<16x1xf32>
    %cst_55 = arith.constant 1.000000e+00 : f32
    %83 = vector.broadcast %cst_55 : f32 to vector<16x1xf32>
    %84 = arith.addf %83, %82 : vector<16x1xf32>
    %85 = arith.divf %83, %84 : vector<16x1xf32>
    %86 = vector.shape_cast %85 : vector<16x1xf32> to vector<16x1xf32>
    %87 = vector.broadcast %86 : vector<16x1xf32> to vector<16x128xf32>
    %c0_56 = arith.constant 0 : index
    %c0_57 = arith.constant 0 : index
    %88 = vector.load %arg23[%c0_56, %c0_57] : memref<16x128xf32, #tpu.memory_space<vmem>>, vector<16x128xf32>
    tpu.vector_store %arg23[%c0_56, %c0_57], %87 {strides = array<i32>} : memref<16x128xf32, #tpu.memory_space<vmem>>, vector<16x128xf32>,
    return
  }
  func.func @transform_0(%arg0: i32) -> (i32, i32) {
    %c0_i32 = arith.constant 0 : i32
    %c0_i32_0 = arith.constant 0 : i32
    %c0_i32_1 = arith.constant 0 : i32
    return %c0_i32, %c0_i32_0 : i32, i32
  }
  func.func @transform_1(%arg0: i32) -> (i32, i32) {
    %c0_i32 = arith.constant 0 : i32
    %c0_i32_0 = arith.constant 0 : i32
    %c0_i32_1 = arith.constant 0 : i32
    return %c0_i32, %c0_i32_0 : i32, i32
  }
  func.func @transform_2(%arg0: i32) -> (i32, i32) {
    %c0_i32 = arith.constant 0 : i32
    %c0_i32_0 = arith.constant 0 : i32
    %c0_i32_1 = arith.constant 0 : i32
    return %c0_i32, %c0_i32_0 : i32, i32
  }
  func.func @transform_3(%arg0: i32) -> (i32, i32) {
    %c0_i32 = arith.constant 0 : i32
    %c0_i32_0 = arith.constant 0 : i32
    %c0_i32_1 = arith.constant 0 : i32
    return %c0_i32, %c0_i32_0 : i32, i32
  }
  func.func @transform_4(%arg0: i32) -> (i32, i32) {
    %c0_i32 = arith.constant 0 : i32
    %c0_i32_0 = arith.constant 0 : i32
    %c0_i32_1 = arith.constant 0 : i32
    return %c0_i32, %c0_i32_0 : i32, i32
  }
  func.func @transform_5(%arg0: i32) -> (i32, i32) {
    %c0_i32 = arith.constant 0 : i32
    %c0_i32_0 = arith.constant 0 : i32
    %c0_i32_1 = arith.constant 0 : i32
    return %c0_i32, %c0_i32_0 : i32, i32
  }
  func.func @transform_6(%arg0: i32) -> (i32, i32) {
    %c0_i32 = arith.constant 0 : i32
    %c0_i32_0 = arith.constant 0 : i32
    %c0_i32_1 = arith.constant 0 : i32
    return %c0_i32, %c0_i32_0 : i32, i32
  }
  func.func @transform_7(%arg0: i32) -> (i32, i32) {
    %c0_i32 = arith.constant 0 : i32
    %c0_i32_0 = arith.constant 0 : i32
    %c0_i32_1 = arith.constant 0 : i32
    return %c0_i32, %c0_i32_0 : i32, i32
  }
  func.func @transform_8(%arg0: i32) -> (i32, i32) {
    %c0_i32 = arith.constant 0 : i32
    %c0_i32_0 = arith.constant 0 : i32
    %c0_i32_1 = arith.constant 0 : i32
    return %c0_i32, %c0_i32_0 : i32, i32
  }
  func.func @transform_9(%arg0: i32) -> (i32, i32) {
    %c0_i32 = arith.constant 0 : i32
    %c0_i32_0 = arith.constant 0 : i32
    %c0_i32_1 = arith.constant 0 : i32
    return %c0_i32, %c0_i32_0 : i32, i32
  }
  func.func @transform_10(%arg0: i32) -> (i32, i32) {
    %c0_i32 = arith.constant 0 : i32
    %c0_i32_0 = arith.constant 0 : i32
    %c0_i32_1 = arith.constant 0 : i32
    return %c0_i32, %c0_i32_0 : i32, i32
  }
  func.func @transform_11(%arg0: i32) -> (i32, i32) {
    %c0_i32 = arith.constant 0 : i32
    %c0_i32_0 = arith.constant 0 : i32
    %c0_i32_1 = arith.constant 0 : i32
    return %c0_i32, %c0_i32_0 : i32, i32
  }
  func.func @transform_12(%arg0: i32) -> (i32, i32) {
    %c0_i32 = arith.constant 0 : i32
    %c0_i32_0 = arith.constant 0 : i32
    %c0_i32_1 = arith.constant 0 : i32
    return %c0_i32, %c0_i32_0 : i32, i32
  }
  func.func @transform_13(%arg0: i32) -> (i32, i32) {
    %c0_i32 = arith.constant 0 : i32
    %c0_i32_0 = arith.constant 0 : i32
    %c0_i32_1 = arith.constant 0 : i32
    return %c0_i32, %c0_i32_0 : i32, i32
  }
  func.func @transform_14(%arg0: i32) -> (i32, i32) {
    %c0_i32 = arith.constant 0 : i32
    %c0_i32_0 = arith.constant 0 : i32
    %c0_i32_1 = arith.constant 0 : i32
    return %c0_i32, %c0_i32_0 : i32, i32
  }
  func.func @transform_15(%arg0: i32) -> (i32, i32) {
    %c0_i32 = arith.constant 0 : i32
    %c0_i32_0 = arith.constant 0 : i32
    %c0_i32_1 = arith.constant 0 : i32
    return %c0_i32, %c0_i32_0 : i32, i32
  }
  func.func @transform_16(%arg0: i32) -> (i32, i32) {
    %c0_i32 = arith.constant 0 : i32
    %c0_i32_0 = arith.constant 0 : i32
    %c0_i32_1 = arith.constant 0 : i32
    return %c0_i32, %c0_i32_0 : i32, i32
  }
  func.func @transform_17(%arg0: i32) -> (i32, i32) {
    %c0_i32 = arith.constant 0 : i32
    %c0_i32_0 = arith.constant 0 : i32
    %c0_i32_1 = arith.constant 0 : i32
    return %c0_i32, %c0_i32_0 : i32, i32
  }
  func.func @transform_18(%arg0: i32) -> (i32, i32) {
    %c0_i32 = arith.constant 0 : i32
    %c0_i32_0 = arith.constant 0 : i32
    %c0_i32_1 = arith.constant 0 : i32
    return %c0_i32, %c0_i32_0 : i32, i32
  }
  func.func @transform_19(%arg0: i32) -> (i32, i32) {
    %c0_i32 = arith.constant 0 : i32
    %c0_i32_0 = arith.constant 0 : i32
    %c0_i32_1 = arith.constant 0 : i32
    return %c0_i32, %c0_i32_0 : i32, i32
  }
  func.func @transform_20(%arg0: i32) -> (i32, i32) {
    %c0_i32 = arith.constant 0 : i32
    %c0_i32_0 = arith.constant 0 : i32
    %c0_i32_1 = arith.constant 0 : i32
    return %c0_i32, %c0_i32_0 : i32, i32
  }
  func.func @transform_21(%arg0: i32) -> (i32, i32) {
    %c0_i32 = arith.constant 0 : i32
    %c0_i32_0 = arith.constant 0 : i32
    %c0_i32_1 = arith.constant 0 : i32
    return %c0_i32, %c0_i32_0 : i32, i32
  }
  func.func @transform_22(%arg0: i32) -> (i32, i32) {
    %c0_i32 = arith.constant 0 : i32
    %c0_i32_0 = arith.constant 0 : i32
    %c0_i32_1 = arith.constant 0 : i32
    return %c0_i32, %c0_i32_0 : i32, i32
  }
}

</mosaic_0001>

<bundles_post_ra>
// kernel: _lambda_.1
= control target key start
LH: loop header
LB: loop body
LE: loop exit
PB: predicated region body
PF: predicated region fallthrough
CT: control target
= control target key end

     0   :  { %s1151_s0 = inlined_call_operand.vmem [shape: f32[8,128], index: 0, kind: input, shape index: {}]   ;;  %s1152_s1 = inlined_call_operand.vmem [shape: f32[8,128], index: 1, kind: input, shape index: {}]   ;;  %s1153_s2 = inlined_call_operand.hbm [shape: f32[128,128], index: 2, kind: input, shape index: {}]   ;;  %s1154_s3 = inlined_call_operand.vmem [shape: f32[1,128], index: 3, kind: input, shape index: {}]   ;;  %s1155_s4 = inlined_call_operand.hbm [shape: f32[128,128], index: 4, kind: input, shape index: {}]   ;;  %s1156_s5 = inlined_call_operand.vmem [shape: f32[1,128], index: 5, kind: input, shape index: {}]   ;;  %s1157_s6 = inlined_call_operand.hbm [shape: f32[128,128], index: 6, kind: input, shape index: {}]   ;;  %s1158_s7 = inlined_call_operand.vmem [shape: f32[1,128], index: 7, kind: input, shape index: {}]   ;;  %s1159_s8 = inlined_call_operand.hbm [shape: f32[128,128], index: 8, kind: input, shape index: {}]   ;;  %s1160_s9 = inlined_call_operand.vmem [shape: f32[1,128], index: 9, kind: input, shape index: {}]   ;;  %s1161_s10 = inlined_call_operand.hbm [shape: f32[128,128], index: 10, kind: input, shape index: {}]   ;;  %s1162_s11 = inlined_call_operand.vmem [shape: f32[1,128], index: 11, kind: input, shape index: {}]   ;;  %s1163_s12 = inlined_call_operand.hbm [shape: f32[128,128], index: 12, kind: input, shape index: {}]   ;;  %s1164_s13 = inlined_call_operand.vmem [shape: f32[1,128], index: 13, kind: input, shape index: {}]   ;;  %s1165_s14 = inlined_call_operand.vmem [shape: f32[1,128], index: 14, kind: input, shape index: {}]   ;;  %s1166_s15 = inlined_call_operand.vmem [shape: f32[1,128], index: 15, kind: input, shape index: {}]   ;;  %s1167_s16 = inlined_call_operand.hbm [shape: f32[8,128], index: 16, kind: output, shape index: {0}]   ;;  %s1168_s17 = inlined_call_operand.hbm [shape: f32[8,128], index: 17, kind: output, shape index: {1}]   ;;  %s1169_s18 = inlined_call_operand.hbm [shape: f32[8,128], index: 18, kind: output, shape index: {2}]   ;;  %s1170_s19 = inlined_call_operand.hbm [shape: f32[8,128], index: 19, kind: output, shape index: {3}]   ;;  %s1171_s20 = inlined_call_operand.vmem [shape: f32[16,128], index: 20, kind: output, shape index: {4}]   ;;  %s1172_s21 = inlined_call_operand.vmem [shape: f32[16,128], index: 21, kind: output, shape index: {5}]   ;;  %s1173_s22 = inlined_call_operand.vmem [shape: f32[16,128], index: 22, kind: output, shape index: {6}]  }
   0x1   :  { %1175 = sst [smem:[#allocation26_spill]] %s1151_s0 }
   0x2   :  { %1176 = sst [smem:[#allocation27_spill]] %s1152_s1 }
   0x3   :  { %1177 = sst [smem:[#allocation28_spill]] %s1153_s2 }
   0x4   :  { %1178 = sst [smem:[#allocation29_spill]] %s1154_s3 }
   0x5   :  { %1179 = sst [smem:[#allocation30_spill]] %s1155_s4 }
   0x6   :  { %1180 = sst [smem:[#allocation31_spill]] %s1156_s5 }
   0x7   :  { %1181 = sst [smem:[#allocation32_spill]] %s1157_s6 }
   0x8   :  { %1182 = sst [smem:[#allocation33_spill]] %s1173_s22 }
   0x9   :  { %28 = vsyncpa [#allocation3], 0 }
   0xa   :  { %29 = vsyncpa [#allocation6], 0 }
   0xb   :  { %30 = vsyncpa [#allocation9], 0 }
   0xc   :  { %31 = vsyncpa [#allocation12], 0 }
   0xd   :  { %32 = vsyncpa [#allocation4], 0 }
   0xe   :  { %33 = vsyncpa [#allocation15], 0 }
   0xf   :  { %34 = vsyncpa [#allocation18], 0  ;;  %s1183_s29 = sld [smem:[#allocation30_spill]]  ;;  %s914_s4 = smov [#allocation5]  }
  0x10   :  { %s60_s0 = sshll.u32 %s914_s4, 4  ;;  %s88_s5 = sshll.u32 %s1159_s8, 4  ;;  %s61_s0 = int_to_ptr.vmem [resolvable:$true] %s60_s0  ;;  %s89_s5 = int_to_ptr.hbm [resolvable:$true] %s88_s5 }
  0x11   :  { %s915_s24 = smov 128   ;;  %s916_s6 = smov 8  }
  0x12   :  { %s917_s25 = smov [#allocation8]   ;;  %s1184_s3 = sld [smem:[#allocation28_spill]] }
  0x13   :  { %s90_s26 = sshll.u32 %s917_s25, 4  ;;  %s1185_s4 = sld [smem:[#allocation32_spill]]  ;;  %s91_s26 = int_to_ptr.vmem [resolvable:$true] %s90_s26 }
  0x14   :  { %96 = dma.hbm_to_vmem [thread:$0]  %s89_s5, 2048, %s91_s26, [#allocation9], %s915_s24, %s915_s24, %s916_s6  }
  0x15   :  { %s58_s30 = sshll.u32 %s1183_s29, 4  ;;  %s918_s1 = smov [#allocation2]   ;;  %s59_s30 = int_to_ptr.hbm [resolvable:$true] %s58_s30 }
  0x16   :  { %66 = dma.hbm_to_vmem [thread:$0]  %s59_s30, 2048, %s61_s0, [#allocation6], %s915_s24, %s915_s24, %s916_s6  }
  0x17   :  { %s45_s22 = sshll.u32 %s918_s1, 4  ;;  %s919_s30 = smov [#allocation7]   ;;  %s46_s22 = int_to_ptr.vmem [resolvable:$true] %s45_s22 }
  0x18   :  { %s43_s28 = sshll.u32 %s1184_s3, 4  ;;  %s75_s0 = sshll.u32 %s919_s30, 4  ;;  %s44_s28 = int_to_ptr.hbm [resolvable:$true] %s43_s28  ;;  %s76_s0 = int_to_ptr.vmem [resolvable:$true] %s75_s0 }
  0x19   :  { %s73_s23 = sshll.u32 %s1185_s4, 4  ;;  %s103_s27 = sshll.u32 %s1161_s10, 4  ;;  %s74_s23 = int_to_ptr.hbm [resolvable:$true] %s73_s23  ;;  %s104_s27 = int_to_ptr.hbm [resolvable:$true] %s103_s27 }
  0x1a   :  { %51 = dma.hbm_to_vmem [thread:$0]  %s44_s28, 2048, %s46_s22, [#allocation3], %s915_s24, %s915_s24, %s916_s6  }
  0x1b   :  { %81 = dma.hbm_to_vmem [thread:$0]  %s74_s23, 2048, %s76_s0, [#allocation6], %s915_s24, %s915_s24, %s916_s6  }
  0x1c   :  { %s118_s3 = sshll.u32 %s1163_s12, 4  ;;  %s920_s8 = smov [#allocation10]   ;;  %s119_s3 = int_to_ptr.hbm [resolvable:$true] %s118_s3 }
  0x1d   :  { %s105_s29 = sshll.u32 %s920_s8, 4  ;;  %s921_s22 = smov [#allocation11]   ;;  %s106_s29 = int_to_ptr.vmem [resolvable:$true] %s105_s29 }
  0x1e   :  { %111 = dma.hbm_to_vmem [thread:$0]  %s104_s27, 2048, %s106_s29, [#allocation9], %s915_s24, %s915_s24, %s916_s6  }
  0x1f   :  { %s120_s10 = sshll.u32 %s921_s22, 4  ;;  %s121_s10 = int_to_ptr.vmem [resolvable:$true] %s120_s10 }
  0x20   :  { %126 = dma.hbm_to_vmem [thread:$0]  %s119_s3, 2048, %s121_s10, [#allocation12], %s915_s24, %s915_s24, %s916_s6  }
  0x21   :  { %900 = dma.done.wait [#allocation3], 2048  }
  0x22   :  { %901 = vsyncadd [#allocation3], 4294965248 }
  0x23   :  { %902 = dma.done.wait [#allocation6], 4096  }
  0x24   :  { %903 = vsyncadd [#allocation6], 4294963200 }
  0x25   :  { %904 = dma.done.wait [#allocation9], 4096  }
  0x26   :  { %905 = vsyncadd [#allocation9], 4294963200 }
  0x27   :  { %906 = dma.done.wait [#allocation12], 2048  }
  0x28   :  { %907 = vsyncadd [#allocation12], 4294965248  ;;  %v173_v0 = vld [vmem:[#allocation2 + $0x78] sm:$0xff]  ;;  %v172_v1 = vld [vmem:[#allocation2 + $0x70] sm:$0xff]  ;;  %s1186_s6 = sld [smem:[#allocation26_spill]]  ;;  %s925_s30 = smov [#allocation13]  }
  0x29   :  { %178 = vmatpush.msra.mxu0 %v173_v0  ;;  %v171_v2 = vld [vmem:[#allocation2 + $0x68] sm:$0xff]  ;;  %v170_v3 = vld [vmem:[#allocation2 + $0x60] sm:$0xff]  ;;  %v214_v4 = vld [vmem:[#allocation5 + $0x78] sm:$0xff]  ;;  %s1187_s23 = sld [smem:[#allocation29_spill]]  ;;  %s926_s3 = smov [#allocation16]  }
  0x2a   :  { %v169_v5 = vld [vmem:[#allocation2 + $0x58] sm:$0xff]  ;;  %219 = vmatpush.msra.mxu2 %v214_v4  ;;  %v213_v6 = vld [vmem:[#allocation5 + $0x70] sm:$0xff]  ;;  %v212_v7 = vld [vmem:[#allocation5 + $0x68] sm:$0xff]  ;;  %s1188_s0 = sld [smem:[#allocation31_spill]]  ;;  %s565_s8 = sshll.u32 %s926_s3, 4  ;;  %s566_s8 = int_to_ptr.vmem [resolvable:$true] %s565_s8 }
  0x2b   :  { %179 = vmatpush.msra.mxu0 %v172_v1  ;;  %v168_v8 = vld [vmem:[#allocation2 + $0x50] sm:$0xff]  ;;  %v211_v9 = vld [vmem:[#allocation5 + $0x60] sm:$0xff]  ;;  %v167_v10 = vld [vmem:[#allocation2 + $0x48] sm:$0xff]  ;;  %s1189_s5 = sld [smem:[#allocation27_spill]]  ;;  %s578_s12 = sshll.u32 %s1170_s19, 4  ;;  %s579_s12 = int_to_ptr.hbm [resolvable:$true] %s578_s12 }
  0x2c   :  { %220 = vmatpush.msra.mxu2 %v213_v6  ;;  %v210_v11 = vld [vmem:[#allocation5 + $0x58] sm:$0xff]  ;;  %v166_v12 = vld [vmem:[#allocation2 + $0x40] sm:$0xff]  ;;  %v209_v14 = vld [vmem:[#allocation5 + $0x50] sm:$0xff] }
  0x2d   :  { %180 = vmatpush.msra.mxu0 %v171_v2  ;;  %v165_v13 = vld [vmem:[#allocation2 + $0x38] sm:$0xff]  ;;  %v208_v15 = vld [vmem:[#allocation5 + $0x48] sm:$0xff]  ;;  %v164_v16 = vld [vmem:[#allocation2 + $0x30] sm:$0xff] }
  0x2e   :  { %221 = vmatpush.msra.mxu2 %v212_v7  ;;  %v207_v17 = vld [vmem:[#allocation5 + $0x40] sm:$0xff]  ;;  %v163_v18 = vld [vmem:[#allocation2 + $0x28] sm:$0xff]  ;;  %v206_v19 = vld [vmem:[#allocation5 + $0x38] sm:$0xff] }
  0x2f   :  { %181 = vmatpush.msra.mxu0 %v170_v3  ;;  %v162_v20 = vld [vmem:[#allocation2 + $0x20] sm:$0xff]  ;;  %v205_v21 = vld [vmem:[#allocation5 + $0x30] sm:$0xff]  ;;  %v161_v22 = vld [vmem:[#allocation2 + $0x18] sm:$0xff] }
  0x30   :  { %222 = vmatpush.msra.mxu2 %v211_v9  ;;  %v204_v23 = vld [vmem:[#allocation5 + $0x28] sm:$0xff]  ;;  %v160_v24 = vld [vmem:[#allocation2 + $0x10] sm:$0xff]  ;;  %v203_v25 = vld [vmem:[#allocation5 + $0x20] sm:$0xff] }
  0x31   :  { %182 = vmatpush.msra.mxu0 %v169_v5  ;;  %v159_v26 = vld [vmem:[#allocation2 + $0x8] sm:$0xff]  ;;  %v202_v27 = vld [vmem:[#allocation5 + $0x18] sm:$0xff]  ;;  %v158_v28 = vld [vmem:[#allocation2] sm:$0xff] }
  0x32   :  { %223 = vmatpush.msra.mxu2 %v210_v11  ;;  %v157_v29 = vld [vmem:[%s1186_s6] sm:$0xff]  ;;  %v201_v30 = vld [vmem:[#allocation5 + $0x10] sm:$0xff]  ;;  %v200_v31 = vld [vmem:[#allocation5 + $0x8] sm:$0xff] }
  0x33   :  { %183 = vmatpush.msra.mxu0 %v168_v8  ;;  %v199_v32 = vld [vmem:[#allocation5] sm:$0xff]  ;;  %v254_v33 = vld [vmem:[#allocation7 + $0x78] sm:$0xff]  ;;  %v253_v34 = vld [vmem:[#allocation7 + $0x70] sm:$0xff] }
  0x34   :  { %224 = vmatpush.msra.mxu2 %v209_v14  ;;  %v252_v35 = vld [vmem:[#allocation7 + $0x68] sm:$0xff]  ;;  %v251_v36 = vld [vmem:[#allocation7 + $0x60] sm:$0xff]  ;;  %v250_v37 = vld [vmem:[#allocation7 + $0x58] sm:$0xff] }
  0x35   :  { %184 = vmatpush.msra.mxu0 %v167_v10  ;;  %v249_v38 = vld [vmem:[#allocation7 + $0x50] sm:$0xff]  ;;  %v248_v39 = vld [vmem:[#allocation7 + $0x48] sm:$0xff]  ;;  %v247_v40 = vld [vmem:[#allocation7 + $0x40] sm:$0xff] }
  0x36   :  { %225 = vmatpush.msra.mxu2 %v208_v15  ;;  %v246_v41 = vld [vmem:[#allocation7 + $0x38] sm:$0xff]  ;;  %v245_v42 = vld [vmem:[#allocation7 + $0x30] sm:$0xff]  ;;  %v244_v43 = vld [vmem:[#allocation7 + $0x28] sm:$0xff] }
  0x37   :  { %185 = vmatpush.msra.mxu0 %v166_v12  ;;  %v243_v44 = vld [vmem:[#allocation7 + $0x20] sm:$0xff]  ;;  %v242_v45 = vld [vmem:[#allocation7 + $0x18] sm:$0xff]  ;;  %v241_v46 = vld [vmem:[#allocation7 + $0x10] sm:$0xff] }
  0x38   :  { %226 = vmatpush.msra.mxu2 %v207_v17  ;;  %v240_v47 = vld [vmem:[#allocation7 + $0x8] sm:$0xff]  ;;  %v239_v48 = vld [vmem:[#allocation7] sm:$0xff]  ;;  %v330_v55 = vld [vmem:[#allocation8 + $0x78] sm:$0xff] }
  0x39   :  { %186 = vmatpush.msra.mxu0 %v165_v13  ;;  %v636_v49 = vld [vmem:[%s1187_s23] ss:$0 sm:$0xff]  ;;  %v430_v56 = vld [vmem:[#allocation11 + $0x78] sm:$0xff]  ;;  %335 = vmatpush.msra.mxu3 %v330_v55  ;;  %v329_v58 = vld [vmem:[#allocation8 + $0x70] sm:$0xff]  ;;  %s556_s23 = sshll.u32 %s1168_s17, 4  ;;  %s567_s17 = sshll.u32 %s1169_s18, 4  ;;  %s557_s23 = int_to_ptr.hbm [resolvable:$true] %s556_s23  ;;  %s568_s17 = int_to_ptr.hbm [resolvable:$true] %s567_s17 }
  0x3a   :  { %227 = vmatpush.msra.mxu2 %v206_v19  ;;  %v637_v53 = vld [vmem:[%s1188_s0] ss:$0 sm:$0xff]  ;;  %435 = vmatpush.msra.mxu1 %v430_v56  ;;  %v429_v59 = vld [vmem:[#allocation11 + $0x70] sm:$0xff]  ;;  %v328_v60 = vld [vmem:[#allocation8 + $0x68] sm:$0xff]  ;;  %s543_s0 = sshll.u32 %s925_s30, 4  ;;  %s544_s0 = int_to_ptr.vmem [resolvable:$true] %s543_s0 }
  0x3b   :  { %187 = vmatpush.msra.mxu0 %v164_v16  ;;  %336 = vmatpush.msra.mxu3 %v329_v58  ;;  %v428_v61 = vld [vmem:[#allocation11 + $0x68] sm:$0xff]  ;;  %v638_v62 = vld [vmem:[%s1158_s7] ss:$0 sm:$0xff]  ;;  %v326_v2 = vld [vmem:[#allocation8 + $0x58] sm:$0xff] }
  0x3c   :  { %228 = vmatpush.msra.mxu2 %v205_v21  ;;  %436 = vmatpush.msra.mxu1 %v429_v59  ;;  %v327_v63 = vld [vmem:[#allocation8 + $0x60] sm:$0xff]  ;;  %v426_v3 = vld [vmem:[#allocation11 + $0x58] sm:$0xff]  ;;  %v325_v5 = vld [vmem:[#allocation8 + $0x50] sm:$0xff] }
  0x3d   :  { %188 = vmatpush.msra.mxu0 %v163_v18  ;;  %337 = vmatpush.msra.mxu3 %v328_v60  ;;  %v427_v0 = vld [vmem:[#allocation11 + $0x60] sm:$0xff]  ;;  %v425_v6 = vld [vmem:[#allocation11 + $0x50] sm:$0xff]  ;;  %v324_v8 = vld [vmem:[#allocation8 + $0x48] sm:$0xff] }
  0x3e   :  { %229 = vmatpush.msra.mxu2 %v204_v23  ;;  %437 = vmatpush.msra.mxu1 %v428_v61  ;;  %v424_v9 = vld [vmem:[#allocation11 + $0x48] sm:$0xff]  ;;  %v323_v11 = vld [vmem:[#allocation8 + $0x40] sm:$0xff]  ;;  %v322_v14 = vld [vmem:[#allocation8 + $0x38] sm:$0xff] }
  0x3f   :  { %189 = vmatpush.msra.mxu0 %v162_v20  ;;  %338 = vmatpush.msra.mxu3 %v327_v63  ;;  %v423_v12 = vld [vmem:[#allocation11 + $0x40] sm:$0xff]  ;;  %v422_v15 = vld [vmem:[#allocation11 + $0x38] sm:$0xff]  ;;  %v321_v16 = vld [vmem:[#allocation8 + $0x30] sm:$0xff] }
  0x40   :  { %230 = vmatpush.msra.mxu2 %v203_v25  ;;  %438 = vmatpush.msra.mxu1 %v427_v0  ;;  %v421_v17 = vld [vmem:[#allocation11 + $0x30] sm:$0xff]  ;;  %v320_v18 = vld [vmem:[#allocation8 + $0x28] sm:$0xff]  ;;  %v319_v20 = vld [vmem:[#allocation8 + $0x20] sm:$0xff] }
  0x41   :  { %190 = vmatpush.msra.mxu0 %v161_v22  ;;  %339 = vmatpush.msra.mxu3 %v326_v2  ;;  %v420_v19 = vld [vmem:[#allocation11 + $0x28] sm:$0xff]  ;;  %v419_v21 = vld [vmem:[#allocation11 + $0x20] sm:$0xff]  ;;  %v418_v25 = vld [vmem:[#allocation11 + $0x18] sm:$0xff] }
  0x42   :  { %231 = vmatpush.msra.mxu2 %v202_v27  ;;  %439 = vmatpush.msra.mxu1 %v426_v3  ;;  %v317_v27 = vld [vmem:[#allocation8 + $0x10] sm:$0xff]  ;;  %v309_v59 = vld [vmem:[%s1189_s5] sm:$0xff]  ;;  %v365_v61 = vld [vmem:[#allocation10 + $0x48] sm:$0xff] }
  0x43   :  { %191 = vmatpush.msra.mxu0 %v160_v24  ;;  %340 = vmatpush.msra.mxu3 %v325_v5  ;;  %v318_v24 = vld [vmem:[#allocation8 + $0x18] sm:$0xff]  ;;  %v366_v55 = vld [vmem:[#allocation10 + $0x50] sm:$0xff]  ;;  %v364_v0 = vld [vmem:[#allocation10 + $0x40] sm:$0xff] }
  0x44   :  { %232 = vmatpush.msra.mxu2 %v201_v30  ;;  %440 = vmatpush.msra.mxu1 %v425_v6  ;;  %v416_v30 = vld [vmem:[#allocation11 + $0x8] sm:$0xff]  ;;  %v362_v6 = vld [vmem:[#allocation10 + $0x30] sm:$0xff] }
  0x45   :  { %192 = vmatpush.msra.mxu0 %v159_v26  ;;  %341 = vmatpush.msra.mxu3 %v324_v8 }
  0x46   :  { %233 = vmatpush.msra.mxu2 %v200_v31  ;;  %441 = vmatpush.msra.mxu1 %v424_v9  ;;  %v315_v31 = vld [vmem:[#allocation8] sm:$0xff]  ;;  %v361_v9 = vld [vmem:[#allocation10 + $0x28] sm:$0xff] }
  0x47   :  { %193 = vmatpush.msra.mxu0 %v158_v28  ;;  %342 = vmatpush.msra.mxu3 %v323_v11  ;;  %v417_v28 = vld [vmem:[#allocation11 + $0x10] sm:$0xff] }
  0x48   :  { %194 = vmatmul.f32.vlgmr.msra.gmra.mxu0 %v157_v29  ;;  %234 = vmatpush.msra.mxu2 %v199_v32  ;;  %v316_v29 = vld [vmem:[#allocation8 + $0x8] sm:$0xff]  ;;  %v415_v32 = vld [vmem:[#allocation11] sm:$0xff] }
  0x49   :  { %442 = vmatpush.msra.mxu1 %v423_v12  ;;  %343 = vmatpush.msra.mxu3 %v322_v14 }
  0x4a   :  { %259 = vmatpush.msrb.mxu2 %v254_v33 }
  0x4b   :  { %443 = vmatpush.msra.mxu1 %v422_v15  ;;  %344 = vmatpush.msra.mxu3 %v321_v16 }
  0x4c   :  { %260 = vmatpush.msrb.mxu2 %v253_v34 }
  0x4d   :  { %444 = vmatpush.msra.mxu1 %v421_v17  ;;  %345 = vmatpush.msra.mxu3 %v320_v18 }
  0x4e   :  { %261 = vmatpush.msrb.mxu2 %v252_v35 }
  0x4f   :  { %445 = vmatpush.msra.mxu1 %v420_v19  ;;  %346 = vmatpush.msra.mxu3 %v319_v20  ;;  %v360_v19 = vld [vmem:[#allocation10 + $0x20] sm:$0xff]  ;;  %v359_v20 = vld [vmem:[#allocation10 + $0x18] sm:$0xff] }
  0x50   :  { %262 = vmatpush.msrb.mxu2 %v251_v36 }
  0x51   :  { %446 = vmatpush.msra.mxu1 %v419_v21  ;;  %347 = vmatpush.msra.mxu3 %v318_v24  ;;  %v358_v21 = vld [vmem:[#allocation10 + $0x10] sm:$0xff]  ;;  %v639_v24 = vld [vmem:[%s1164_s13] ss:$0 sm:$0xff]  ;;  %s1190_s13 = sld [smem:[#allocation33_spill]] }
  0x52   :  { %263 = vmatpush.msrb.mxu2 %v250_v37 }
  0x53   :  { %447 = vmatpush.msra.mxu1 %v418_v25  ;;  %348 = vmatpush.msra.mxu3 %v317_v27  ;;  %v640_v25 = vld [vmem:[%s1165_s14] ss:$0 sm:$0xff] }
  0x54   :  { %264 = vmatpush.msrb.mxu2 %v249_v38 }
  0x55   :  { %448 = vmatpush.msra.mxu1 %v417_v28  ;;  %349 = vmatpush.msra.mxu3 %v316_v29  ;;  %v641_v29 = vld [vmem:[%s1160_s9] ss:$0 sm:$0xff] }
  0x56   :  { %265 = vmatpush.msrb.mxu2 %v248_v39 }
  0x57   :  { %449 = vmatpush.msra.mxu1 %v416_v30  ;;  %350 = vmatpush.msra.mxu3 %v315_v31 }
  0x58   :  { %266 = vmatpush.msrb.mxu2 %v247_v40 }
  0x59   :  { %450 = vmatpush.msra.mxu1 %v415_v32 }
  0x5a   :  { %267 = vmatpush.msrb.mxu2 %v246_v41 }
  0x5c   :  { %268 = vmatpush.msrb.mxu2 %v245_v42 }
  0x5e   :  { %269 = vmatpush.msrb.mxu2 %v244_v43 }
  0x60   :  { %270 = vmatpush.msrb.mxu2 %v243_v44  ;;  %v371_v44 = vld [vmem:[#allocation10 + $0x78] sm:$0xff] }
  0x61   :  { %376 = vmatpush.msrb.mxu0 %v371_v44 }
  0x62   :  { %271 = vmatpush.msrb.mxu2 %v242_v45  ;;  %v370_v45 = vld [vmem:[#allocation10 + $0x70] sm:$0xff] }
  0x63   :  { %377 = vmatpush.msrb.mxu0 %v370_v45 }
  0x64   :  { %272 = vmatpush.msrb.mxu2 %v241_v46 }
  0x66   :  { %273 = vmatpush.msrb.mxu2 %v240_v47  ;;  %v922_v47 = vmov 8.0  }
  0x68   :  { %274 = vmatpush.msrb.mxu2 %v239_v48  ;;  %v369_v48 = vld [vmem:[#allocation10 + $0x68] sm:$0xff] }
  0x69   :  { %378 = vmatpush.msrb.mxu0 %v369_v48 }
  0xc5   :  { %v195_v50 = vpop.f32.mrf.mxu0 }
  0xc6   :  { %v196_v51 = vadd.f32 %v636_v49, %v195_v50  ;;  %v368_v50 = vld [vmem:[#allocation10 + $0x60] sm:$0xff] }
  0xc7   :  { %379 = vmatpush.msrb.mxu0 %v368_v50 }
  0xc8   :  { %v198_v52 = vmax.f32 %v196_v51, 0.0 }
  0xca   :  { %235 = vmatmul.f32.vlgmr.msra.gmra.mxu2 %v198_v52 }
  0xd2   :  { %275 = vmatmul.f32.vlgmr.msrb.gmra.mxu2 %v198_v52  ;;  %v367_v52 = vld [vmem:[#allocation10 + $0x58] sm:$0xff] }
  0xd3   :  { %380 = vmatpush.msrb.mxu0 %v367_v52 }
  0xd5   :  { %381 = vmatpush.msrb.mxu0 %v366_v55 }
  0xd7   :  { %382 = vmatpush.msrb.mxu0 %v365_v61 }
  0xd9   :  { %383 = vmatpush.msrb.mxu0 %v364_v0 }
 0x14d   :  { %v236_v54 = vpop.f32.mrf.mxu2 }
 0x14e   :  { %v1088_v57 = vadd.f32 %v637_v53, %v236_v54 }
 0x150   :  { %312 = vst [vmem:[#allocation13] sm:$0xff] %v1088_v57 }
 0x155   :  { %v276_v1 = vpop.f32.mrf.mxu2 }
 0x156   :  { %v1094_v4 = vadd.f32 %v638_v62, %v276_v1 }
 0x158   :  { %v282_v7 = vand.u32 2147483647, %v1094_v4  ;;  %313 = vst [vmem:[#allocation14] sm:$0xff] %v1094_v4  ;;  %v279_v38 = vmax.f32 %v1094_v4, 0.0  ;;  %vm280_vm1 = vcmp.ne.f32.partialorder %v1094_v4, %v1094_v4 }
 0x15a   :  { %v283_v10 = vsub.f32 0.0, %v282_v7 }
 0x15c   :  { %v284_v13 = vmul.f32 1.442695, %v283_v10  ;;  %v411_v10 = vlaneseq }
 0x15e   :  { %644 = vpow2.f32 %v284_v13  ;;  %v412_v14 = vand.u32 127, %v411_v10 }
 0x160   :  { %vm413_vm5 = vcmp.lt.s32.totalorder %v412_v14, 4 }
 0x164   :  { %v645_v22 = vpop.eup %644 }
 0x165   :  { %v286_v23 = vadd.f32 1.0, %v645_v22  ;;  %v289_v26 = vmul.f32 -0.5, %v645_v22  ;;  %v292_v34 = vand.u32 2147483647, %v645_v22 }
 0x167   :  { %646 = vlog2.f32 %v286_v23  ;;  %v290_v33 = vadd.f32 1.0, %v289_v26  ;;  %vm293_vm0 = vcmp.lt.f32.partialorder %v292_v34, 0.0004427343  ;;  %v356_v23 = vld [vmem:[#allocation10] sm:$0xff] }
 0x169   :  { %v291_v37 = vmul.f32 %v645_v22, %v290_v33  ;;  %v357_v22 = vld [vmem:[#allocation10 + $0x8] sm:$0xff] }
 0x16d   :  { %v647_v35 = vpop.eup %646 }
 0x16e   :  { %v288_v36 = vmul.f32 0.6931472, %v647_v35 }
 0x170   :  { %v294_v39 = vsel %vm293_vm0, %v291_v37, %v288_v36  ;;  %v923_v36 = vmov 0   ;;  %v642_v37 = vld [vmem:[%s1166_s15] ss:$0 sm:$0xff]  ;;  %s545_s15 = sshll.u32 %s1167_s16, 4  ;;  %s927_s16 = smov [#allocation17]   ;;  %s546_s15 = int_to_ptr.hbm [resolvable:$true] %s545_s15 }
 0x171   :  { %v295_v40 = vadd.f32 %v294_v39, %v279_v38  ;;  %633 = vset.pattern.permute.xlu1 %v923_v36  ;;  %634 = vset.pattern.permute.xlu2 %v923_v36  ;;  %548 = dma.vmem_to_hbm [thread:$0]  %s544_s0, 128, %s546_s15, [#allocation4]  }
 0x172   :  { %635 = vset.pattern.permute.xlu0 %v923_v36  ;;  %s576_s29 = sshll.u32 %s927_s16, 4  ;;  %s577_s29 = int_to_ptr.vmem [resolvable:$true] %s576_s29 }
 0x173   :  { %v296_v41 = vsel %vm280_vm1, %v1094_v4, %v295_v40  ;;  %v363_v4 = vld [vmem:[#allocation10 + $0x38] sm:$0xff] }
 0x174   :  { %648 = vrsqrt.f32 %v296_v41  ;;  %vm304_vm2 = vcmp.eq.f32.partialorder %v296_v41, inf  ;;  %v307_v58 = vand.u32 2147483648, %v296_v41  ;;  %vm306_vm3 = vcmp.eq.f32.partialorder %v296_v41, 0.0  ;;  %384 = vmatpush.msrb.mxu0 %v363_v4 }
 0x175   :  { %650 = vrcp.f32 %v922_v47 }
 0x176   :  { %385 = vmatpush.msrb.mxu0 %v362_v6 }
 0x178   :  { %386 = vmatpush.msrb.mxu0 %v361_v9 }
 0x17a   :  { %v649_v42 = vpop.eup %648  ;;  %387 = vmatpush.msrb.mxu0 %v360_v19 }
 0x17b   :  { %v298_v43 = vmul.f32 %v649_v42, %v296_v41  ;;  %v651_v53 = vpop.eup %650 }
 0x17c   :  { %v404_v60 = vmul.f32 8.0, %v651_v53  ;;  %vm408_vm4 = vweird.f32 %v651_v53  ;;  %388 = vmatpush.msrb.mxu0 %v359_v20 }
 0x17d   :  { %v299_v46 = vmul.f32 %v649_v42, %v298_v43  ;;  %v643_v43 = vld [vmem:[%s1162_s11] ss:$0 sm:$0xff] }
 0x17e   :  { %v405_v2 = vsub.f32 1.0, %v404_v60  ;;  %389 = vmatpush.msrb.mxu0 %v358_v21 }
 0x17f   :  { %v300_v49 = vmul.f32 0.5, %v299_v46 }
 0x180   :  { %v406_v7 = vmul.f32 %v651_v53, %v405_v2  ;;  %390 = vmatpush.msrb.mxu0 %v357_v22 }
 0x181   :  { %v301_v51 = vsub.f32 1.5, %v300_v49 }
 0x182   :  { %v407_v12 = vadd.f32 %v651_v53, %v406_v7  ;;  %391 = vmatpush.msrb.mxu0 %v356_v23 }
 0x183   :  { %v302_v54 = vmul.f32 %v649_v42, %v301_v51 }
 0x184   :  { %v409_v15 = vsel %vm408_vm4, %v651_v53, %v407_v12 }
 0x185   :  { %v303_v56 = vmul.f32 %v302_v54, %v296_v41 }
 0x187   :  { %v305_v62 = vsel %vm304_vm2, %v296_v41, %v303_v56 }
 0x188   :  { %v308_v63 = vsel %vm306_vm3, %v307_v58, %v305_v62 }
 0x189   :  { %v310_v1 = vmul.f32 %v309_v59, %v308_v63 }
 0x18b   :  { %v311_v3 = vadd.f32 %v310_v1, %v1088_v57 }
 0x18d   :  { %351 = vmatmul.f32.vlgmr.msra.gmra.mxu3 %v311_v3  ;;  %314 = vst [vmem:[#allocation16] sm:$0xff] %v311_v3  ;;  %451 = vmatmul.f32.vlgmr.msra.gmra.mxu1 %v311_v3  ;;  %v397_v5 = vrot.slane %v311_v3, 4 }
 0x18f   :  { %v398_v8 = vadd.f32 %v397_v5, %v311_v3 }
 0x191   :  { %v399_v11 = vrot.slane %v398_v8, 2 }
 0x193   :  { %v400_v13 = vadd.f32 %v399_v11, %v398_v8 }
 0x195   :  { %v401_v57 = vrot.slane %v400_v13, 1 }
 0x197   :  { %v402_v16 = vadd.f32 %v401_v57, %v400_v13 }
 0x199   :  { %v410_v17 = vmul.f32 %v409_v15, %v402_v16 }
 0x19b   :  { %v414_v18 = vsel %vm413_vm5, %v311_v3, %v410_v17 }
 0x19c   :  { %454 = vmatmul.f32.gmra.mxu1 %v414_v18 }
 0x20a   :  { %v452_v26 = vpop.f32.mrf.mxu1 }
 0x20b   :  { %v453_v27 = vadd.f32 %v639_v24, %v452_v26 }
 0x20d   :  { %458 = vst [vmem:[%s1171_s20] sm:$0xff] %v453_v27  ;;  %v464_v28 = vmul.f32 %v640_v25, %v453_v27 }
 0x20f   :  { %466 = vadd.xlane.f32.xlu0 %v464_v28 }
 0x210   :  { %v352_v30 = vpop.f32.mrf.mxu3 }
 0x211   :  { %v353_v31 = vadd.f32 %v641_v29, %v352_v30 }
 0x213   :  { %v355_v32 = vmax.f32 %v353_v31, 0.0 }
 0x215   :  { %392 = vmatmul.f32.vlgmr.msrb.gmra.mxu0 %v355_v32 }
 0x219   :  { %v455_v33 = vpop.f32.mrf.mxu1 }
 0x21a   :  { %v456_v34 = vadd.f32 %v639_v24, %v455_v33 }
 0x21c   :  { %459 = vst [vmem:[%s1171_s20 + $0x8] sm:$0xff] %v456_v34  ;;  %v465_v35 = vmul.f32 %v640_v25, %v456_v34  ;;  %s924_s20 = smov [#allocation14]  }
 0x21d   :  { %s554_s1 = sshll.u32 %s924_s20, 4  ;;  %s555_s1 = int_to_ptr.vmem [resolvable:$true] %s554_s1 }
 0x21e   :  { %468 = vadd.xlane.f32.xlu0 %v465_v35  ;;  %559 = dma.vmem_to_hbm [thread:$0]  %s555_s1, 128, %s557_s23, [#allocation15]  }
 0x21f   :  { %570 = dma.vmem_to_hbm [thread:$0]  %s566_s8, 128, %s568_s17, [#allocation15]  }
 0x282   :  { %v467_v38 = vpop.xlane.xlu0 %466 }
 0x283   :  { %v474_v39 = vadd.f32 %v642_v37, %v467_v38 }
 0x285   :  { %v617_v40 = vmul.f32 -1.442695, %v474_v39  ;;  %478 = vperm.xlu1 %633, %v474_v39  }
 0x287   :  { %652 = vpow2.f32 %v617_v40 }
 0x28d   :  { %v653_v41 = vpop.eup %652 }
 0x28e   :  { %v494_v42 = vadd.f32 1.0, %v653_v41 }
 0x290   :  { %654 = vrcp.f32 %v494_v42  ;;  %v507_v52 = vand.u32 2147483648, %v494_v42  ;;  %v505_v54 = vand.u32 2147483647, %v494_v42  ;;  %vm501_vm7 = vweird.f32 %v494_v42 }
 0x291   :  { %v469_v44 = vpop.xlane.xlu0 %468 }
 0x292   :  { %v475_v45 = vadd.f32 %v642_v37, %v469_v44  ;;  %v393_v46 = vpop.f32.mrf.mxu0  ;;  %v508_v59 = vor.u32 1.1754944e-38, %v507_v52  ;;  %vm506_vm9 = vcmp.eq.f32.partialorder %v505_v54, 8.507059e+37 }
 0x293   :  { %v394_v47 = vadd.f32 %v643_v43, %v393_v46 }
 0x294   :  { %v618_v48 = vmul.f32 -1.442695, %v475_v45  ;;  %483 = vperm.xlu1 %633, %v475_v45  }
 0x295   :  { %396 = vst [vmem:[#allocation17] sm:$0xff] %v394_v47 }
 0x296   :  { %v655_v49 = vpop.eup %654  ;;  %656 = vpow2.f32 %v618_v48  ;;  %581 = dma.vmem_to_hbm [thread:$0]  %s577_s29, 128, %s579_s12, [#allocation18]  }
 0x297   :  { %v497_v50 = vmul.f32 %v655_v49, %v494_v42  ;;  %vm502_vm6 = vweird.f32 %v655_v49 }
 0x298   :  { %vm503_vm8 = vmor %vm501_vm7, %vm502_vm6 }
 0x299   :  { %v498_v51 = vsub.f32 1.0, %v497_v50 }
 0x29b   :  { %v499_v53 = vmul.f32 %v655_v49, %v498_v51 }
 0x29c   :  { %v657_v55 = vpop.eup %656 }
 0x29d   :  { %v495_v56 = vadd.f32 1.0, %v657_v55  ;;  %v500_v58 = vadd.f32 %v655_v49, %v499_v53 }
 0x29f   :  { %658 = vrcp.f32 %v495_v56  ;;  %v504_v60 = vsel %vm503_vm8, %v655_v49, %v500_v58  ;;  %v522_v1 = vand.u32 2147483648, %v495_v56  ;;  %v520_v3 = vand.u32 2147483647, %v495_v56 }
 0x2a0   :  { %v509_v61 = vsel %vm506_vm9, %v508_v59, %v504_v60  ;;  %vm516_vm11 = vweird.f32 %v495_v56 }
 0x2a1   :  { %528 = vperm.xlu2 %634, %v509_v61   ;;  %v523_v5 = vor.u32 1.1754944e-38, %v522_v1  ;;  %vm521_vm13 = vcmp.eq.f32.partialorder %v520_v3, 8.507059e+37 }
 0x2a5   :  { %v659_v62 = vpop.eup %658 }
 0x2a6   :  { %v512_v63 = vmul.f32 %v659_v62, %v495_v56  ;;  %vm517_vm10 = vweird.f32 %v659_v62 }
 0x2a7   :  { %vm518_vm12 = vmor %vm516_vm11, %vm517_vm10 }
 0x2a8   :  { %v513_v0 = vsub.f32 1.0, %v512_v63 }
 0x2aa   :  { %v514_v2 = vmul.f32 %v659_v62, %v513_v0 }
 0x2ac   :  { %v515_v4 = vadd.f32 %v659_v62, %v514_v2 }
 0x2ae   :  { %v519_v6 = vsel %vm518_vm12, %v659_v62, %v515_v4 }
 0x2af   :  { %v524_v7 = vsel %vm521_vm13, %v523_v5, %v519_v6 }
 0x2b0   :  { %533 = vperm.xlu2 %634, %v524_v7  }
 0x2f7   :  { %v479_v8 = vpop.permute.xlu1 %478 }
 0x2f8   :  { %486 = vst [vmem:[%s1172_s21] sm:$0xff] %v479_v8 }
 0x2fb   :  { %v529_v9 = vpop.permute.xlu2 %528 }
 0x2fc   :  { %536 = vst [vmem:[%s1190_s13] sm:$0xff] %v529_v9 }
 0x306   :  { %v484_v10 = vpop.permute.xlu1 %483 }
 0x307   :  { %487 = vst [vmem:[%s1172_s21 + $0x8] sm:$0xff] %v484_v10 }
 0x30a   :  { %v534_v11 = vpop.permute.xlu2 %533 }
 0x30b   :  { %537 = vst [vmem:[%s1190_s13 + $0x8] sm:$0xff] %v534_v11 }
 0x30c   :  { %908 = dma.done.wait [#allocation4], 128  }
 0x30d   :  { %909 = vsyncadd [#allocation4], 4294967168 }
 0x30e   :  { %910 = dma.done.wait [#allocation15], 256  }
 0x30f   :  { %911 = vsyncadd [#allocation15], 4294967040 }
 0x310   :  { %912 = dma.done.wait [#allocation18], 128  }
 0x311   :  { %913 = vsyncadd [#allocation18], 4294967168 }
 0x312   :  { %610 = vsyncpa [#allocation3], 1 }
 0x313   :  { %611 = vsyncpa [#allocation6], 1 }
 0x314   :  { %612 = vsyncpa [#allocation9], 1 }
 0x315   :  { %613 = vsyncpa [#allocation12], 1 }
 0x316   :  { %614 = vsyncpa [#allocation4], 1 }
 0x317   :  { %615 = vsyncpa [#allocation15], 1 }
 0x318   :  { %616 = vsyncpa [#allocation18], 1 }

</bundles_post_ra>
